<compile_context>
chip_gen: v7x
topology: tpu7x:2x2x1
jax: 0.10.0
libtpu: 0.0.40
codegen_flags: <defaults>
</compile_context>

<pallas_src>
import math

import jax
import jax.numpy as jnp
import numpy as np
from jax.experimental import pallas as pl
from jax.experimental.pallas import tpu as pltpu

_EPS = 1e-5
# Per-block f32 budget.  With double-buffered input + output blocks plus f32
# temporaries this stays well under the v7x 32 MiB scoped / 64 MiB physical
# VMEM, and leaves headroom on v5e/v6e as well.
_BLOCK_BUDGET_BYTES = 4 * 1024 * 1024
_VMEM_LIMIT_BYTES = 32 * 1024 * 1024


def _pick_c_tile(C, vbs, hw):
    """Largest channel tile whose f32 block fits the budget and is tiling-valid."""
    divisors = sorted((d for d in range(1, C + 1) if C % d == 0), reverse=True)
    for ct in divisors:
        # second-to-last block dim must be a multiple of 8 or equal the full C
        if ct != C and ct % 8 != 0:
            continue
        if vbs * ct * hw * 4 <= _BLOCK_BUDGET_BYTES:
            return ct
    for ct in sorted(divisors):
        if ct == C or ct % 8 == 0:
            return ct
    return C


def _gbn_kernel(x_ref, gamma_ref, beta_ref, o_ref):
    # x_ref: (vbs, C_TILE, HW) one (virtual batch, channel tile) block.
    # gamma_ref / beta_ref: (1, C_TILE, 1) slices aligned with the channel tile.
    x = x_ref[...].astype(jnp.float32)
    vbs, ct, hw = x.shape
    inv_n = 1.0 / float(vbs * hw)

    # One pass over the tile: sum and sum-of-squares per channel.
    s = jnp.sum(x, axis=(0, 2), keepdims=True)          # (1, Ct, 1)
    sq = jnp.sum(x * x, axis=(0, 2), keepdims=True)     # (1, Ct, 1)
    mean = s * inv_n
    var = sq * inv_n - mean * mean                      # biased variance
    inv_std = jax.lax.rsqrt(var + _EPS)

    gamma = gamma_ref[...].astype(jnp.float32)          # (1, Ct, 1)
    beta = beta_ref[...].astype(jnp.float32)            # (1, Ct, 1)
    scale = gamma * inv_std                             # per-channel
    shift = beta - mean * scale

    # Single mul+add elementwise pass.
    o_ref[...] = (x * scale + shift).astype(o_ref.dtype)


def ghost_batch_norm2d(x, gamma, beta, virtual_batch_size=128):
    """x: (N, C, H, W). gamma, beta: (C,). Returns (N, C, H, W)."""
    N, C, H, W = x.shape
    num_chunks = int(math.ceil(N / virtual_batch_size))
    # TODO(synk): ragged last chunk (torch.chunk with N % num_chunks != 0) not handled.
    assert N % num_chunks == 0, "N must split into equal virtual batches"
    vbs = N // num_chunks
    HW = H * W

    # Lane-dense layout: last dim HW instead of W (layout-preserving reshape).
    x3 = x.reshape(N, C, HW)
    gamma3 = gamma.reshape(1, C, 1)
    beta3 = beta.reshape(1, C, 1)

    c_tile = _pick_c_tile(C, vbs, HW)
    grid = (num_chunks, C // c_tile)

    out3 = pl.pallas_call(
        _gbn_kernel,
        out_shape=jax.ShapeDtypeStruct((N, C, HW), x.dtype),
        grid_spec=pltpu.PrefetchScalarGridSpec(
            num_scalar_prefetch=0,
            grid=grid,
            in_specs=[
                pl.BlockSpec((vbs, c_tile, HW), lambda i, j: (i, j, 0)),
                pl.BlockSpec((1, c_tile, 1), lambda i, j: (0, j, 0)),
                pl.BlockSpec((1, c_tile, 1), lambda i, j: (0, j, 0)),
            ],
            out_specs=pl.BlockSpec((vbs, c_tile, HW), lambda i, j: (i, j, 0)),
        ),
        compiler_params=pltpu.CompilerParams(
            dimension_semantics=("parallel", "parallel"),
            vmem_limit_bytes=_VMEM_LIMIT_BYTES,
        ),
    )(x3, gamma3, beta3)

    return out3.reshape(N, C, H, W)


def _reference(x, gamma, beta, virtual_batch_size):
    N = x.shape[0]
    num_chunks = int(math.ceil(N / virtual_batch_size))
    chunks = jnp.split(x, num_chunks, axis=0)
    outs = []
    for xc in chunks:
        xc32 = xc.astype(jnp.float32)
        mean = jnp.mean(xc32, axis=(0, 2, 3), keepdims=True)
        var = jnp.mean((xc32 - mean) ** 2, axis=(0, 2, 3), keepdims=True)
        y = (xc32 - mean) / jnp.sqrt(var + _EPS)
        y = y * gamma.reshape(1, -1, 1, 1) + beta.reshape(1, -1, 1, 1)
        outs.append(y.astype(x.dtype))
    return jnp.concatenate(outs, axis=0)


if __name__ == "__main__":
    # Module config: input_dim (channels) = 4, virtual_batch_size = 4 (small demo),
    # input x: (N=8, C=4, H=16, W=16)  ->  2 virtual batches of size 4.
    key = jax.random.PRNGKey(0)
    kx, kg, kb = jax.random.split(key, 3)

    N, C, H, W = 8, 4, 16, 16
    vbs = 4
    x = jax.random.normal(kx, (N, C, H, W), dtype=jnp.float32)

    # nn.BatchNorm2d default init is weight=1, bias=0; perturb deterministically
    # so the affine path is actually exercised.
    gamma = jnp.ones((C,), jnp.float32) + 0.1 * jax.random.normal(kg, (C,), jnp.float32)
    beta = jnp.zeros((C,), jnp.float32) + 0.1 * jax.random.normal(kb, (C,), jnp.float32)

    out = ghost_batch_norm2d(x, gamma, beta, virtual_batch_size=vbs)
    out = jax.block_until_ready(out)

    ref = _reference(x, gamma, beta, vbs)
    np.testing.assert_allclose(np.asarray(out), np.asarray(ref), rtol=2e-5, atol=2e-5)

    print("KERNEL_OK")
</pallas_src>

<mosaic_0001>
module attributes {stable_mosaic.version = 11 : i64} {
  func.func @_gbn_kernel(%arg0: i32, %arg1: i32, %arg2: memref<4x4x256xf32, #tpu.memory_space<vmem>>, %arg3: memref<1x4x1xf32, #tpu.memory_space<vmem>>, %arg4: memref<1x4x1xf32, #tpu.memory_space<vmem>>, %arg5: memref<4x4x256xf32, #tpu.memory_space<vmem>>) attributes {dimension_semantics = [#tpu.dimension_semantics<parallel>, #tpu.dimension_semantics<parallel>], iteration_bounds = array<i64: 2, 1>, scalar_prefetch = 0 : i64, scratch_operands = 0 : i64, tpu.core_type = #tpu.core_type<tc>, window_params = [{transform_indices = @transform_0, window_bounds = array<i64: 4, 4, 256>}, {transform_indices = @transform_1, window_bounds = array<i64: 1, 4, 1>}, {transform_indices = @transform_2, window_bounds = array<i64: 1, 4, 1>}, {transform_indices = @transform_3, window_bounds = array<i64: 4, 4, 256>}]} {
    %c0 = arith.constant 0 : index
    %c0_0 = arith.constant 0 : index
    %c0_1 = arith.constant 0 : index
    %0 = vector.load %arg2[%c0, %c0_0, %c0_1] : memref<4x4x256xf32, #tpu.memory_space<vmem>>, vector<4x4x256xf32>
    %cst = arith.constant dense<0.000000e+00> : vector<4xf32>
    %1 = vector.multi_reduction <add>, %0, %cst [0, 2] : vector<4x4x256xf32> to vector<4xf32>
    %2 = vector.shape_cast %1 : vector<4xf32> to vector<1x4x1xf32>
    %3 = arith.mulf %0, %0 : vector<4x4x256xf32>
    %cst_2 = arith.constant dense<0.000000e+00> : vector<4xf32>
    %4 = vector.multi_reduction <add>, %3, %cst_2 [0, 2] : vector<4x4x256xf32> to vector<4xf32>
    %5 = vector.shape_cast %4 : vector<4xf32> to vector<1x4x1xf32>
    %cst_3 = arith.constant 9.765625E-4 : f32
    %6 = vector.broadcast %cst_3 : f32 to vector<1x4x1xf32>
    %7 = arith.mulf %2, %6 : vector<1x4x1xf32>
    %cst_4 = arith.constant 9.765625E-4 : f32
    %8 = vector.broadcast %cst_4 : f32 to vector<1x4x1xf32>
    %9 = arith.mulf %5, %8 : vector<1x4x1xf32>
    %10 = arith.mulf %7, %7 : vector<1x4x1xf32>
    %11 = arith.subf %9, %10 : vector<1x4x1xf32>
    %cst_5 = arith.constant 9.99999974E-6 : f32
    %12 = vector.broadcast %cst_5 : f32 to vector<1x4x1xf32>
    %13 = arith.addf %11, %12 : vector<1x4x1xf32>
    %14 = math.rsqrt %13 : vector<1x4x1xf32>
    %c0_6 = arith.constant 0 : index
    %c0_7 = arith.constant 0 : index
    %c0_8 = arith.constant 0 : index
    %15 = vector.load %arg3[%c0_6, %c0_7, %c0_8] : memref<1x4x1xf32, #tpu.memory_space<vmem>>, vector<1x4x1xf32>
    %c0_9 = arith.constant 0 : index
    %c0_10 = arith.constant 0 : index
    %c0_11 = arith.constant 0 : index
    %16 = vector.load %arg4[%c0_9, %c0_10, %c0_11] : memref<1x4x1xf32, #tpu.memory_space<vmem>>, vector<1x4x1xf32>
    %17 = arith.mulf %15, %14 : vector<1x4x1xf32>
    %18 = arith.mulf %7, %17 : vector<1x4x1xf32>
    %19 = arith.subf %16, %18 : vector<1x4x1xf32>
    %20 = vector.broadcast %17 : vector<1x4x1xf32> to vector<4x4x256xf32>
    %21 = arith.mulf %0, %20 : vector<4x4x256xf32>
    %22 = vector.broadcast %19 : vector<1x4x1xf32> to vector<4x4x256xf32>
    %23 = arith.addf %21, %22 : vector<4x4x256xf32>
    %c0_12 = arith.constant 0 : index
    %c0_13 = arith.constant 0 : index
    %c0_14 = arith.constant 0 : index
    %24 = vector.load %arg5[%c0_12, %c0_13, %c0_14] : memref<4x4x256xf32, #tpu.memory_space<vmem>>, vector<4x4x256xf32>
    tpu.vector_store %arg5[%c0_12, %c0_13, %c0_14], %23 {strides = array<i32>} : memref<4x4x256xf32, #tpu.memory_space<vmem>>, vector<4x4x256xf32>,
    return
  }
  func.func @transform_0(%arg0: i32, %arg1: i32) -> (i32, i32, i32) {
    %c0_i32 = arith.constant 0 : i32
    %c0_i32_0 = arith.constant 0 : i32
    return %arg0, %arg1, %c0_i32 : i32, i32, i32
  }
  func.func @transform_1(%arg0: i32, %arg1: i32) -> (i32, i32, i32) {
    %c0_i32 = arith.constant 0 : i32
    %c0_i32_0 = arith.constant 0 : i32
    %c0_i32_1 = arith.constant 0 : i32
    return %c0_i32, %arg1, %c0_i32_0 : i32, i32, i32
  }
  func.func @transform_2(%arg0: i32, %arg1: i32) -> (i32, i32, i32) {
    %c0_i32 = arith.constant 0 : i32
    %c0_i32_0 = arith.constant 0 : i32
    %c0_i32_1 = arith.constant 0 : i32
    return %c0_i32, %arg1, %c0_i32_0 : i32, i32, i32
  }
  func.func @transform_3(%arg0: i32, %arg1: i32) -> (i32, i32, i32) {
    %c0_i32 = arith.constant 0 : i32
    %c0_i32_0 = arith.constant 0 : i32
    return %arg0, %arg1, %c0_i32 : i32, i32, i32
  }
}

</mosaic_0001>

<bundles_post_ra>
// kernel: tpu_custom_call.1
= control target key start
LH: loop header
LB: loop body
LE: loop exit
PB: predicated region body
PF: predicated region fallthrough
CT: control target
= control target key end

     0   :  { %8 = vsyncpa [#allocation3], 0  ;;  %s966_s0 = inlined_call_operand.hbm [shape: f32[8,4,256], index: 0, kind: input, shape index: {}]   ;;  %s967_s1 = inlined_call_operand.vmem [shape: f32[1,4,1], index: 1, kind: input, shape index: {}]   ;;  %s968_s2 = inlined_call_operand.vmem [shape: f32[1,4,1], index: 2, kind: input, shape index: {}]   ;;  %s969_s3 = inlined_call_operand.hbm [shape: f32[8,4,256], index: 3, kind: output, shape index: {}]  }
   0x1   :  { %10 = vsyncpa [#allocation3 + $0x1], 0 }
   0x2   :  { %11 = vsyncpa [#allocation4], 0 }
   0x3   :  { %13 = vsyncpa [#allocation4 + $0x1], 0  ;;  %s733_s12 = smov 0   ;;  %s735_s13 = smov 0  }
   0x4   :  { %s737_s14 = smov 0   ;;  %s739_s15 = smov 0  }
   0x5   :  { %s741_s16 = smov 0   ;;  %s743_s17 = smov 0  }
   0x6 LB: > { %s492_s18 = sadd.s32 4294967295, %s703_s17   ;;  %s493_s19 = sadd.s32 4294967294, %s703_s17   ;;  %s703_s17 = sphi %s743_s17, %s19_s17   ;;  %s699_s16 = sphi %s741_s16, %s984_s16   ;;  %s695_s15 = sphi %s739_s15, %s983_s15   ;;  %s691_s14 = sphi %s737_s14, %s982_s14   ;;  %s687_s13 = sphi %s735_s13, %s981_s13   ;;  %s683_s12 = sphi %s733_s12, %s980_s12  }
   0x7   : > { %s31_s20 = sadd.s32 1, %s699_s16  ;;  %s40_s21 = sadd.s32 1, %s691_s14 }
   0x8   : > { %p33_p0 = scmp.ge.s32.totalorder %s31_s20, 2  ;;  %p47_p1 = scmp.ne.s32.totalorder %s691_s14, %s687_s13 }
   0x9   : > { %p48_p2 = scmp.eq.s32.totalorder %s703_s17, 0  ;;  %p53_p3 = scmp.ne.s32.totalorder %s687_s13, %s683_s12 }
   0xa   : > { %s986_s20 = smov (%p33_p0, %s31_s20), 0  ;;  %p54_p5 = scmp.eq.s32.totalorder %s492_s18, 0 }
   0xb   : > { %p774_p4 = por %p48_p2, %p47_p1  ;;  %s35_s23 = ssub.s32 %s699_s16, %s986_s20 }
   0xc   : > { %p131_p6 = scmp.eq.s32.totalorder %s492_s18, 1  ;;  %p38_p7 = scmp.eq.s32.totalorder %s35_s23, 0 }
   0xd   : > { %p780_p8 = por %p54_p5, %p53_p3  ;;  %p137_p10 = scmp.eq.s32.totalorder %s493_s19, 1 }
   0xe   : > { %p784_p9 = por %p131_p6, %p47_p1  ;;  %p527_p13 = scmp.lt.s32.totalorder %s703_s17, 2 }
   0xf   : > { %s789_s26 = scalar_select %p38_p7, %s691_s14, %s40_s21  }
  0x10   : > { %s973_s25 = scalar_select %p784_p9, 1, 0 }
  0x11   : > { %p791_p11 = por %p137_p10, %p53_p3  ;;  %s171_s28 = sand.u32 1, %s691_s14  }
  0x12   : > { %s498_s29 = sshll.u32 %s171_s28, 5  ;;  %s512_s30 = sshll.u32 %s699_s16, 9 }
  0x13   : > { %s974_s27 = scalar_select %p791_p11, 1, 0 }
  0x14   : > { %s802_s6 = scalar_lea.hbm %s966_s0, %s512_s30  ;;  %s175_s7 = scalar_lea.vmem [#allocation2], %s498_s29 }
  0x15   : > { %s185_s8 = sshll.u32 %s175_s7, 4  ;;  %p808_p0 = pnand %p527_p13, %p774_p4  ;;  %s804_s8 = int_to_ptr.vmem [resolvable:$true] %s185_s8 }
  0x16   : > { %s813_s10 = scalar_lea.sflag [#allocation3], %s171_s28  ;;  %s591_s11 = scalar_lea.hbm %s802_s6, 512 }
  0x17   : > { %p592_p2 = scmp.ne.s32.totalorder %s802_s6, %s591_s11  ;;  %p593_p3 = pneg %p808_p0 }
  0x18   : > { %s596_s21 = scalar_lea.hbm %s966_s0, 1024  ;;  %p597_p4 = scmp.lt.u32.totalorder %s802_s6, %s966_s0 }
  0x19   : > { %p594_p5 = pnand %p593_p3, %p592_p2  ;;  %p598_p7 = scmp.lt.u32.totalorder %s596_s21, %s591_s11 }
  0x1a   : > { %p600_p13 = scmp.lt.u32.totalorder %s591_s11, %s802_s6 }
  0x1b   : > { %p595_p6 = pneg %p594_p5  ;;  %p599_p10 = por %p598_p7, %p597_p4 }
  0x1d   : > { %p601_p12 = por %p600_p13, %p599_p10 }
  0x1f   : > { %p602_p1 = pnand %p601_p12, %p595_p6 }
  0x21   : > { %605 = shalt.err (!%p602_p1)
}
  0x22   : > { %s606_s28 = scalar_lea.vmem %s804_s8, 512  ;;  %s705_s29 = smov [#allocation2]  }
  0x23   : > { %p607_p2 = scmp.ne.s32.totalorder %s804_s8, %s606_s28  ;;  %s611_s30 = sshll.u32 %s705_s29, 4  ;;  %s612_s30 = int_to_ptr.vmem [resolvable:$false] %s611_s30 }
  0x24   : > { %s613_s4 = scalar_lea.vmem %s612_s30, 1024  ;;  %p614_p9 = scmp.lt.s32.totalorder %s804_s8, %s612_s30 }
  0x25   : > { %p609_p5 = pnand %p607_p2, %p593_p3  ;;  %p615_p4 = scmp.lt.s32.totalorder %s613_s4, %s606_s28 }
  0x27   : > { %p610_p11 = pneg %p609_p5  ;;  %p616_p7 = por %p615_p4, %p614_p9 }
  0x29   : > { %p617_p10 = pnand %p616_p7, %p610_p11 }
  0x2b   : > { %620 = shalt.err (!%p617_p10)
}
  0x2c   : > { %s706_s5 = smov 128   ;;  %s707_s7 = smov 8  }
  0x2d   : > { %522 = dma.hbm_to_vmem [thread:$0]  (!%p808_p0), %s802_s6, 512, %s804_s8, %s813_s10, %s706_s5, %s706_s5, %s707_s7  }
  0x2e   : > { %p193_p12 = scmp.lt.s32.totalorder %s703_s17, 3  ;;  %p976_p1 = scmp.ge.s32.totalorder %s703_s17, 1 }
  0x30   : > { %p194_p3 = pnand %p976_p1, %p193_p12 }
  0x31   : > { %s845_s11 = sand.u32 (!%p194_p3), 1, %s687_s13  }
  0x32   : > { %197 = sbr.rel (%p194_p3) target bundleno = 393 (0x189), region = 32  ;;  %s503_s18 = sshll.u32 (!%p194_p3), %s845_s11, 5 }
  0x33   : > { %s200_s19 = scalar_lea.sflag (!%p194_p3), [#allocation3], %s845_s11  ;;  %s203_s21 = scalar_lea.vmem (!%p194_p3), [#allocation2], %s503_s18 }
  0x39   : > { %674 = dma.done.wait (%p780_p8), %s200_s19, 512  }
  0x3a   : > { %676 = vsyncadd (%p780_p8), %s200_s19, 4294966784  ;;  %vm260_vm0 = vcmask 1043456   ;;  %v855_v0 = vld [vmem:[%s203_s21] sm:$0xff]  ;;  %v857_v1 = vld [vmem:[%s203_s21 + $0x8] sm:$0xff]  ;;  %v708_v46 = vmov 0   ;;  %v329_v62 = vlaneseq  ;;  %s514_s10 = sshll.u32 %s695_s15, 9 }
  0x3b   : > { %v859_v2 = vld [vmem:[%s203_s21 + $0x10] sm:$0xff]  ;;  %v252_v3 = vcombine.high %v855_v0, %v855_v0  ;;  %v253_v4 = vcombine.high %v857_v1, %v857_v1  ;;  %v261_v5 = vsel %vm260_vm0, %v855_v0, 0.0  ;;  %v264_v7 = vsel %vm260_vm0, %v857_v1, 0.0  ;;  %v876_v12 = vld [vmem:[%s203_s21 + $0x18] sm:$0xff]  ;;  %583 = vset.pattern.permute.xlu1 %v708_v46  ;;  %584 = vset.pattern.permute.xlu0 %v708_v46  ;;  %v317_v54 = vld [vmem:[%s967_s1] sm:$0xf]  ;;  %s915_s30 = scalar_lea.hbm %s969_s3, %s514_s10 }
  0x3c   : > { %v278_v8 = vmul.f32 %v855_v0, %v855_v0  ;;  %v254_v9 = vcombine.high %v859_v2, %v859_v2  ;;  %v279_v11 = vmul.f32 %v857_v1, %v857_v1  ;;  %v280_v14 = vmul.f32 %v859_v2, %v859_v2  ;;  %v318_v57 = vld [vmem:[%s968_s2] sm:$0xf]  ;;  %s233_s22 = scalar_lea.vmem [#allocation5], %s503_s18  ;;  %s359_s15 = scalar_lea.sflag [#allocation4], %s845_s11 }
  0x3d   : > { %v262_v6 = vsel %vm260_vm0, %v252_v3, 0.0  ;;  %v266_v13 = vsel %vm260_vm0, %v253_v4, 0.0  ;;  %v268_v19 = vsel %vm260_vm0, %v859_v2, 0.0  ;;  %v255_v22 = vcombine.high %v876_v12, %v876_v12  ;;  %s375_s23 = sshll.u32 %s233_s22, 4  ;;  %p977_p9 = scmp.ne.s32.totalorder %s973_s25, 0  ;;  %s917_s23 = int_to_ptr.vmem [resolvable:$true] %s375_s23 }
  0x3e   : > { %v263_v10 = vadd.f32 %v262_v6, %v261_v5  ;;  %v286_v15 = vcombine.high %v278_v8, %v278_v8  ;;  %v294_v16 = vsel %vm260_vm0, %v278_v8, 0.0  ;;  %v287_v18 = vcombine.high %v279_v11, %v279_v11  ;;  %s621_s4 = scalar_lea.vmem %s917_s23, 512  ;;  %s710_s5 = smov [#allocation5]  }
  0x3f   : > { %v297_v21 = vsel %vm260_vm0, %v279_v11, 0.0  ;;  %v270_v25 = vsel %vm260_vm0, %v254_v9, 0.0  ;;  %v281_v26 = vmul.f32 %v876_v12, %v876_v12  ;;  %v288_v27 = vcombine.high %v280_v14, %v280_v14  ;;  %p622_p8 = scmp.ne.s32.totalorder %s917_s23, %s621_s4  ;;  %s625_s7 = sshll.u32 %s710_s5, 4  ;;  %s626_s7 = int_to_ptr.vmem [resolvable:$false] %s625_s7 }
  0x40   : > { %v265_v17 = vadd.f32 %v264_v7, %v263_v10  ;;  %v295_v20 = vsel %vm260_vm0, %v286_v15, 0.0  ;;  %v299_v28 = vsel %vm260_vm0, %v287_v18, 0.0  ;;  %v272_v31 = vsel %vm260_vm0, %v876_v12, 0.0  ;;  %s627_s18 = scalar_lea.vmem %s626_s7, 1024  ;;  %p628_p6 = scmp.lt.s32.totalorder %s917_s23, %s626_s7 }
  0x41   : > { %v296_v24 = vadd.f32 %v295_v20, %v294_v16  ;;  %v301_v32 = vsel %vm260_vm0, %v280_v14, 0.0  ;;  %v274_v35 = vsel %vm260_vm0, %v255_v22, 0.0  ;;  %v289_v36 = vcombine.high %v281_v26, %v281_v26  ;;  %p623_p11 = pnand %p622_p8, %p977_p9  ;;  %p629_p13 = scmp.lt.s32.totalorder %s627_s18, %s621_s4 }
  0x42   : > { %v267_v23 = vadd.f32 %v266_v13, %v265_v17  ;;  %v303_v37 = vsel %vm260_vm0, %v288_v27, 0.0  ;;  %v305_v40 = vsel %vm260_vm0, %v281_v26, 0.0  ;;  %v709_v60 = vmov 839922192  }
  0x43   : > { %v298_v30 = vadd.f32 %v297_v21, %v296_v24  ;;  %v307_v43 = vsel %vm260_vm0, %v289_v36, 0.0  ;;  %v327_v61 = vunpack.c.l.s4 %v709_v60  ;;  %v330_v3 = vshrl.u32 %v329_v62, 7  ;;  %p624_p0 = pneg %p623_p11  ;;  %p630_p2 = por %p629_p13, %p628_p6 }
  0x44   : > { %v269_v29 = vadd.f32 %v268_v19, %v267_v23 }
  0x45   : > { %v300_v34 = vadd.f32 %v299_v28, %v298_v30  ;;  %v328_v63 = vunpack.c.0.s8 %v327_v61  ;;  %p631_p5 = pnand %p630_p2, %p624_p0 }
  0x46   : > { %v271_v33 = vadd.f32 %v270_v25, %v269_v29 }
  0x47   : > { %v302_v39 = vadd.f32 %v301_v32, %v300_v34  ;;  %v331_v4 = vsub.s32 %v328_v63, %v330_v3 }
  0x48   : > { %v273_v38 = vadd.f32 %v272_v31, %v271_v33 }
  0x49   : > { %v304_v42 = vadd.f32 %v303_v37, %v302_v39 }
  0x4a   : > { %v275_v41 = vadd.f32 %v274_v35, %v273_v38 }
  0x4b   : > { %v306_v44 = vadd.f32 %v305_v40, %v304_v42 }
  0x4c   : > { %276 = vadd.xlane.f32.xlu0 %v275_v41 }
  0x4d   : > { %v308_v45 = vadd.f32 %v307_v43, %v306_v44 }
  0x50   : > { %309 = vadd.xlane.f32.xlu0 %v308_v45 }
  0xd9   : > { %v277_v47 = vpop.xlane.xlu0 %276 }
  0xda   : > { %v311_v48 = vmul.f32 0.0009765625, %v277_v47 }
  0xdc   : > { %v313_v50 = vmul.f32 %v311_v48, %v311_v48 }
  0xdd   : > { %v310_v49 = vpop.xlane.xlu0 %309 }
  0xde   : > { %v312_v51 = vmul.f32 0.0009765625, %v310_v49 }
  0xe0   : > { %v314_v52 = vsub.f32 %v312_v51, %v313_v50 }
  0xe2   : > { %v315_v53 = vadd.f32 1e-05, %v314_v52 }
  0xe4   : > { %589 = vrsqrt.f32 %v315_v53 }
  0xee   : > { %v590_v55 = vpop.eup %589 }
  0xef   : > { %v319_v56 = vmul.f32 %v590_v55, %v317_v54 }
  0xf1   : > { %324 = vperm.xlu1 %583, %v319_v56   ;;  %v320_v58 = vmul.f32 %v319_v56, %v311_v48 }
  0xf3   : > { %v321_v59 = vsub.f32 %v318_v57, %v320_v58 }
  0xf5   : > { %340 = vperm.xlu1 %583, %v321_v59  }
 0x170   : > { %v325_v5 = vpop.permute.xlu1 %324 }
 0x171   : > { %v332_v6 = vrot.slane %v325_v5, %v331_v4 }
 0x173   : > { %v334_v7 = vmul.f32 %v332_v6, %v855_v0  ;;  %v335_v9 = vmul.f32 %v332_v6, %v857_v1  ;;  %v336_v10 = vmul.f32 %v332_v6, %v859_v2  ;;  %v337_v11 = vmul.f32 %v332_v6, %v876_v12 }
 0x174   : > { %v341_v8 = vpop.permute.xlu1 %340 }
 0x175   : > { %v348_v13 = vrot.slane %v341_v8, %v331_v4 }
 0x177   : > { %v350_v0 = vadd.f32 %v348_v13, %v334_v7  ;;  %v351_v14 = vadd.f32 %v348_v13, %v335_v9  ;;  %v352_v15 = vadd.f32 %v348_v13, %v336_v10  ;;  %v353_v1 = vadd.f32 %v348_v13, %v337_v11 }
 0x179   : > { %354 = vst [vmem:[%s233_s22] sm:$0xff] %v350_v0  ;;  %355 = vst [vmem:[%s233_s22 + $0x8] sm:$0xff] %v351_v14 }
 0x17a   : > { %356 = vst [vmem:[%s233_s22 + $0x10] sm:$0xff] %v352_v15  ;;  %357 = vst [vmem:[%s233_s22 + $0x18] sm:$0xff] %v353_v1 }
 0x17b   : > { %634 = shalt.err (!%p631_p5)
}
 0x17c   : > { %s635_s19 = scalar_lea.hbm %s915_s30, 512  ;;  %s639_s6 = scalar_lea.hbm %s969_s3, 1024 }
 0x17d   : > { %p636_p4 = scmp.ne.s32.totalorder %s915_s30, %s635_s19  ;;  %p640_p12 = scmp.lt.u32.totalorder %s915_s30, %s969_s3 }
 0x17e   : > { %p641_p1 = scmp.lt.u32.totalorder %s639_s6, %s635_s19  ;;  %p643_p8 = scmp.lt.u32.totalorder %s635_s19, %s915_s30 }
 0x17f   : > { %p637_p7 = pnand %p636_p4, %p977_p9 }
 0x180   : > { %p642_p3 = por %p641_p1, %p640_p12 }
 0x181   : > { %p638_p10 = pneg %p637_p7 }
 0x182   : > { %p644_p11 = por %p643_p8, %p642_p3 }
 0x184   : > { %p645_p0 = pnand %p644_p11, %p638_p10 }
 0x186   : > { %648 = shalt.err (!%p645_p0)
}
 0x187   : > { %s711_s10 = smov 128   ;;  %s712_s22 = smov 8  }
 0x188   : > { %517 = dma.vmem_to_hbm [thread:$0]  (%p977_p9), %s917_s23, 512, %s915_s30, %s359_s15, %s711_s10, %s711_s10, %s712_s22  }
 0x189 PF: > { %s390_s28 = sand.u32 1, %s683_s12   ;;  %p978_p6 = scmp.ne.s32.totalorder %s974_s27, 0 }
 0x18a   : > { %p979_p13 = scmp.ge.s32.totalorder %s703_s17, 2  ;;  %s391_s29 = scalar_lea.sflag [#allocation4], %s390_s28 }
 0x18c   : > { %p524_p2 = pnand %p979_p13, %p978_p6 }
 0x18e   : > { %678 = dma.done.wait (!%p524_p2), %s391_s29, 512  }
 0x18f   : > { %680 = vsyncadd (!%p524_p2), %s391_s29, 4294966784  ;;  %s19_s17 = sadd.s32 1, %s703_s17   ;;  %s980_s12 = smov %s687_s13 }
 0x190   : > { %p16_p5 = scmp.ge.s32.totalorder %s19_s17, 4   ;;  %s981_s13 = smov %s691_s14 }
 0x191   : > { %s982_s14 = smov %s789_s26  ;;  %s983_s15 = smov %s699_s16 }
 0x192   : > { %s984_s16 = smov %s986_s20  ;;  %18 = sbr.rel (!%p16_p5) target bundleno = 6 (0x6), region = 83 }
 0x199   :  { %396 = vsyncpa [#allocation3], 1 }
 0x19a   :  { %398 = vsyncpa [#allocation3 + $0x1], 1 }
 0x19b   :  { %399 = vsyncpa [#allocation4], 1 }
 0x19c   :  { %401 = vsyncpa [#allocation4 + $0x1], 1 }

</bundles_post_ra>
